<compile_context>
chip_gen: v6e
topology: v6e:2x2x1
jax: 0.10.0
libtpu: 0.0.40
codegen_flags: <defaults>
</compile_context>

<pallas_src>
import jax
import jax.numpy as jnp
from jax.experimental import pallas as pl
from jax.experimental.pallas import tpu as pltpu


def _round_up(a, m):
    return (a + m - 1) // m * m


# ---------------------------------------------------------------------------
# Fused kernel: conv1 (3x3, pad 1) + BN + ReLU  ->  conv2 (3x3, pad 1) + BN +
# ReLU + residual.  Everything works on the row-flattened padded image with
# the flattened spatial axis on lanes; tap (di, dj) of the stencil is a
# statically shifted lane-slice.  The dj shifts are pre-stacked along the
# channel (sublane) axis so each conv is 3 accumulated MXU matmuls with
# K = 3*Cin (implicit im2col, zero HBM expansion).
# ---------------------------------------------------------------------------
def _make_block_kernel(h, w, wp, c1, c2):
    l_out = h * wp                 # conv output rows (flattened, incl. wrap cols)
    l_in1 = (h + 3) * wp           # conv1 input slab (1 top + 2 bottom pad rows)
    l_sc = (h + 3) * wp            # padded x1 scratch length
    off = 2 * wp                   # lane offset of x1 pixel (0,0) inside scratch

    def kernel(x_ref, w1_ref, sc1_ref, sh1_ref, w2_ref, sc2_ref, sh2_ref,
               mask_ref, o_ref, xs_ref, x1s_ref):
        # --- stack the 3 dj-shifted copies of the padded input along channels
        #     (VMEM only -> no im2col expansion in HBM) -----------------------
        xin = x_ref[0]                                        # (c1, L_in1) bf16
        for dj in range(3):
            xs_ref[dj * c1:(dj + 1) * c1, 0:l_in1 - dj] = xin[:, dj:]

        # --- conv1: 3 fat-K matmuls (K = 3*c1) + folded BN + ReLU ------------
        acc = jnp.zeros((c2, l_out), jnp.float32)
        for di in range(3):
            a = xs_ref[:, di * wp: di * wp + l_out]           # (3*c1, L_out)
            acc = acc + jnp.dot(w1_ref[di], a,
                                preferred_element_type=jnp.float32)
        y1 = jnp.maximum(acc * sc1_ref[...] + sh1_ref[...], 0.0)
        # Zero the wrap columns BEFORE conv2 consumes them (border correctness).
        y1 = (y1 * mask_ref[...]).astype(jnp.bfloat16)

        # --- stage x1 as a zero-padded, dj-shifted channel stack in VMEM -----
        x1s_ref[...] = jnp.zeros((3 * c2, l_sc), jnp.bfloat16)
        for dj in range(3):
            x1s_ref[dj * c2:(dj + 1) * c2, off - dj: off - dj + l_out] = y1

        # --- conv2: 3 fat-K matmuls (K = 3*c2) + BN + ReLU + residual --------
        acc2 = jnp.zeros((c2, l_out), jnp.float32)
        for di in range(3):
            b = (di + 1) * wp - 1
            a2 = x1s_ref[:, b: b + l_out]                     # (3*c2, L_out)
            acc2 = acc2 + jnp.dot(w2_ref[di], a2,
                                  preferred_element_type=jnp.float32)
        y2 = jnp.maximum(acc2 * sc2_ref[...] + sh2_ref[...], 0.0)
        y2 = y2 + x1s_ref[0:c2, off: off + l_out].astype(jnp.float32)  # + x1
        o_ref[0] = y2.astype(o_ref.dtype)

    return kernel


# ---------------------------------------------------------------------------
# Parameters (PyTorch layouts), BN folding, forward pass.
# ---------------------------------------------------------------------------
def bn_fold(conv_bias, gamma, beta, running_mean, running_var, eps=1e-5):
    inv = gamma * jax.lax.rsqrt(running_var + eps)
    return inv, (conv_bias - running_mean) * inv + beta


def conv_block_forward(x_nchw, p):
    """PyTorch conv_block: x1 = ReLU(BN(conv1(x))); x2 = x1 + ReLU(BN(conv2(x1)))."""
    n, c1, h, w = x_nchw.shape
    c2 = p["w1"].shape[0]
    wp = _round_up(w + 2, 8)          # padded row width (>= w + 2, alignment-friendly)
    l_in1 = (h + 3) * wp
    l_out = h * wp

    # Halo pad (1 top / 2 bottom rows, 1 left / wp-w-1 right cols), flatten the
    # spatial dims onto the lane axis, bf16 MXU input.  No NCHW<->NHWC transpose.
    x_pad = jnp.pad(x_nchw.astype(jnp.float32),
                    ((0, 0), (0, 0), (1, 2), (1, wp - w - 1)))
    x2d = x_pad.reshape(n, c1, l_in1).astype(jnp.bfloat16)

    # PyTorch (O, I, kh, kw) -> per-di tap (Cout, 3*Cin) with K ordered (dj, cin)
    # to match the dj-shifted channel stacks built inside the kernel.
    w1 = jnp.transpose(p["w1"], (2, 0, 3, 1)).reshape(3, c2, 3 * c1).astype(jnp.bfloat16)
    w2 = jnp.transpose(p["w2"], (2, 0, 3, 1)).reshape(3, c2, 3 * c2).astype(jnp.bfloat16)

    sc1, sh1 = bn_fold(p["b1"], p["g1"], p["be1"], p["rm1"], p["rv1"])
    sc2, sh2 = bn_fold(p["b2"], p["g2"], p["be2"], p["rm2"], p["rv2"])
    sc1 = sc1.reshape(c2, 1).astype(jnp.float32)
    sh1 = sh1.reshape(c2, 1).astype(jnp.float32)
    sc2 = sc2.reshape(c2, 1).astype(jnp.float32)
    sh2 = sh2.reshape(c2, 1).astype(jnp.float32)

    # 1.0 on real output columns, 0.0 on the (wp - w) wrap columns of each row.
    mask = (jnp.arange(l_out) % wp < w).astype(jnp.float32).reshape(1, l_out)

    resident2 = lambda i: (0, 0)
    resident3 = lambda i: (0, 0, 0)
    in_specs = [
        pl.BlockSpec((1, c1, l_in1), lambda i: (i, 0, 0)),    # per-image slab
        pl.BlockSpec((3, c2, 3 * c1), resident3),             # conv1 taps (resident)
        pl.BlockSpec((c2, 1), resident2),                     # BN1 scale
        pl.BlockSpec((c2, 1), resident2),                     # BN1 shift
        pl.BlockSpec((3, c2, 3 * c2), resident3),             # conv2 taps (resident)
        pl.BlockSpec((c2, 1), resident2),                     # BN2 scale
        pl.BlockSpec((c2, 1), resident2),                     # BN2 shift
        pl.BlockSpec((1, l_out), resident2),                  # wrap-column mask
    ]

    flops = 18 * n * l_out * c2 * (c1 + c2)          # 2 * 9 * L * Cin * Cout per conv
    bytes_accessed = (n * c1 * l_in1 * 2 + n * c2 * l_out * 4
                      + 9 * c2 * (c1 + c2) * 2 + 4 * c2 * 4 + l_out * 4)

    out = pl.pallas_call(
        _make_block_kernel(h, w, wp, c1, c2),
        out_shape=jax.ShapeDtypeStruct((n, c2, l_out), jnp.float32),
        grid_spec=pltpu.PrefetchScalarGridSpec(
            num_scalar_prefetch=0,
            grid=(n,),
            in_specs=in_specs,
            out_specs=pl.BlockSpec((1, c2, l_out), lambda i: (i, 0, 0)),
            scratch_shapes=[
                pltpu.VMEM((3 * c1, l_in1), jnp.bfloat16),        # dj-stack of x
                pltpu.VMEM((3 * c2, (h + 3) * wp), jnp.bfloat16),  # padded x1 stack
            ]),
        compiler_params=pltpu.CompilerParams(
            dimension_semantics=("parallel",),
            vmem_limit_bytes=32 * 1024 * 1024),
        cost_estimate=pl.CostEstimate(flops=flops, transcendentals=0,
                                      bytes_accessed=bytes_accessed),
    )(x2d, w1, sc1, sh1, w2, sc2, sh2, mask)

    # (n, c2, h*wp) -> NCHW, dropping the wrap columns.  Output is already NCHW.
    return out.reshape(n, c2, h, wp)[:, :, :, :w]


def init_params(key, in_ch, out_ch):
    ks = jax.random.split(key, 4)
    return {
        # PyTorch Conv2d weight layout: (out_ch, in_ch, kh, kw)
        "w1": jax.random.normal(ks[0], (out_ch, in_ch, 3, 3), jnp.float32) * 0.05,
        "b1": jax.random.normal(ks[1], (out_ch,), jnp.float32) * 0.01,
        "g1": jnp.ones((out_ch,), jnp.float32),
        "be1": jnp.zeros((out_ch,), jnp.float32),
        "rm1": jnp.zeros((out_ch,), jnp.float32),
        "rv1": jnp.ones((out_ch,), jnp.float32),
        "w2": jax.random.normal(ks[2], (out_ch, out_ch, 3, 3), jnp.float32) * 0.05,
        "b2": jax.random.normal(ks[3], (out_ch,), jnp.float32) * 0.01,
        "g2": jnp.ones((out_ch,), jnp.float32),
        "be2": jnp.zeros((out_ch,), jnp.float32),
        "rm2": jnp.zeros((out_ch,), jnp.float32),
        "rv2": jnp.ones((out_ch,), jnp.float32),
    }


def _reference_conv_block(x_nchw, p):
    """Pure-JAX f32 reference (eval-mode BN) for a numerical sanity check."""
    x = jnp.transpose(x_nchw, (0, 2, 3, 1)).astype(jnp.float32)

    def conv_bn_relu(inp, w_oihw, b, g, be, rm, rv):
        w = jnp.transpose(w_oihw, (2, 3, 1, 0))
        y = jax.lax.conv_general_dilated(
            inp, w, window_strides=(1, 1), padding=((1, 1), (1, 1)),
            dimension_numbers=("NHWC", "HWIO", "NHWC"))
        sc, sh = bn_fold(b, g, be, rm, rv)
        return jnp.maximum(y * sc + sh, 0.0)

    x1 = conv_bn_relu(x, p["w1"], p["b1"], p["g1"], p["be1"], p["rm1"], p["rv1"])
    x2 = x1 + conv_bn_relu(x1, p["w2"], p["b2"], p["g2"], p["be2"],
                           p["rm2"], p["rv2"])
    return jnp.transpose(x2, (0, 3, 1, 2))


if __name__ == "__main__":
    key = jax.random.PRNGKey(0)
    k_x, k_p = jax.random.split(key)

    in_ch, out_ch = 4, 8
    x = jax.random.normal(k_x, (2, in_ch, 16, 16), jnp.float32)   # NCHW
    params = init_params(k_p, in_ch, out_ch)

    out = jax.block_until_ready(conv_block_forward(x, params))

    assert out.shape == (2, out_ch, 16, 16), out.shape
    assert bool(jnp.all(jnp.isfinite(out)))

    ref = jax.block_until_ready(_reference_conv_block(x, params))
    max_err = float(jnp.max(jnp.abs(out - ref)))
    assert max_err < 5e-2, f"max abs error vs reference: {max_err}"

    print("KERNEL_OK")
</pallas_src>

<mosaic_0001>
module attributes {stable_mosaic.version = 11 : i64} {
  func.func @kernel(%arg0: i32, %arg1: memref<1x4x456xbf16, #tpu.memory_space<vmem>>, %arg2: memref<3x8x12xbf16, #tpu.memory_space<vmem>>, %arg3: memref<8x1xf32, #tpu.memory_space<vmem>>, %arg4: memref<8x1xf32, #tpu.memory_space<vmem>>, %arg5: memref<3x8x24xbf16, #tpu.memory_space<vmem>>, %arg6: memref<8x1xf32, #tpu.memory_space<vmem>>, %arg7: memref<8x1xf32, #tpu.memory_space<vmem>>, %arg8: memref<1x384xf32, #tpu.memory_space<vmem>>, %arg9: memref<1x8x384xf32, #tpu.memory_space<vmem>>, %arg10: memref<12x456xbf16, #tpu.memory_space<vmem>>, %arg11: memref<24x456xbf16, #tpu.memory_space<vmem>>) attributes {dimension_semantics = [#tpu.dimension_semantics<parallel>], iteration_bounds = array<i64: 2>, scalar_prefetch = 0 : i64, scratch_operands = 2 : i64, tpu.core_type = #tpu.core_type<tc>, window_params = [{transform_indices = @transform_0, window_bounds = array<i64: 1, 4, 456>}, {pipeline_mode = #tpu.pipeline_mode<synchronous>, transform_indices = @transform_1, window_bounds = array<i64: 3, 8, 12>}, {pipeline_mode = #tpu.pipeline_mode<synchronous>, transform_indices = @transform_2, window_bounds = array<i64: 8, 1>}, {pipeline_mode = #tpu.pipeline_mode<synchronous>, transform_indices = @transform_3, window_bounds = array<i64: 8, 1>}, {pipeline_mode = #tpu.pipeline_mode<synchronous>, transform_indices = @transform_4, window_bounds = array<i64: 3, 8, 24>}, {pipeline_mode = #tpu.pipeline_mode<synchronous>, transform_indices = @transform_5, window_bounds = array<i64: 8, 1>}, {pipeline_mode = #tpu.pipeline_mode<synchronous>, transform_indices = @transform_6, window_bounds = array<i64: 8, 1>}, {pipeline_mode = #tpu.pipeline_mode<synchronous>, transform_indices = @transform_7, window_bounds = array<i64: 1, 384>}, {transform_indices = @transform_8, window_bounds = array<i64: 1, 8, 384>}]} {
    %c0 = arith.constant 0 : index
    %c0_0 = arith.constant 0 : index
    %c0_1 = arith.constant 0 : index
    %0 = vector.load %arg1[%c0, %c0_0, %c0_1] : memref<1x4x456xbf16, #tpu.memory_space<vmem>>, vector<1x4x456xbf16>
    %1 = vector.shape_cast %0 : vector<1x4x456xbf16> to vector<4x456xbf16>
    %c0_2 = arith.constant 0 : index
    %c0_3 = arith.constant 0 : index
    %2 = vector.load %arg10[%c0_2, %c0_3] : memref<12x456xbf16, #tpu.memory_space<vmem>>, vector<4x456xbf16>
    tpu.vector_store %arg10[%c0_2, %c0_3], %1 {strides = array<i32>} : memref<12x456xbf16, #tpu.memory_space<vmem>>, vector<4x456xbf16>,
    %3 = vector.extract_strided_slice %1 {offsets = [0, 1], sizes = [4, 455], strides = [1, 1]} : vector<4x456xbf16> to vector<4x455xbf16>
    %c4 = arith.constant 4 : index
    %c0_4 = arith.constant 0 : index
    %4 = vector.load %arg10[%c4, %c0_4] : memref<12x456xbf16, #tpu.memory_space<vmem>>, vector<4x455xbf16>
    tpu.vector_store %arg10[%c4, %c0_4], %3 {strides = array<i32>} : memref<12x456xbf16, #tpu.memory_space<vmem>>, vector<4x455xbf16>,
    %5 = vector.extract_strided_slice %1 {offsets = [0, 2], sizes = [4, 454], strides = [1, 1]} : vector<4x456xbf16> to vector<4x454xbf16>
    %c8 = arith.constant 8 : index
    %c0_5 = arith.constant 0 : index
    %6 = vector.load %arg10[%c8, %c0_5] : memref<12x456xbf16, #tpu.memory_space<vmem>>, vector<4x454xbf16>
    tpu.vector_store %arg10[%c8, %c0_5], %5 {strides = array<i32>} : memref<12x456xbf16, #tpu.memory_space<vmem>>, vector<4x454xbf16>,
    %cst = arith.constant 0.000000e+00 : f32
    %7 = vector.broadcast %cst : f32 to vector<8x384xf32>
    %c0_6 = arith.constant 0 : index
    %c0_7 = arith.constant 0 : index
    %8 = vector.load %arg10[%c0_6, %c0_7] : memref<12x456xbf16, #tpu.memory_space<vmem>>, vector<12x384xbf16>
    %c0_8 = arith.constant 0 : index
    %c0_9 = arith.constant 0 : index
    %c0_10 = arith.constant 0 : index
    %9 = vector.load %arg2[%c0_8, %c0_9, %c0_10] : memref<3x8x12xbf16, #tpu.memory_space<vmem>>, vector<1x8x12xbf16>
    %10 = vector.shape_cast %9 : vector<1x8x12xbf16> to vector<8x12xbf16>
    %cst_11 = arith.constant dense<0.000000e+00> : vector<8x384xf32>
    %11 = tpu.matmul %10, %8, %cst_11 {dimension_numbers = #tpu.dot_dimension_numbers<[1], [0], [0], [1], [0, 0, 1, 1], [], []>} : vector<8x12xbf16>, vector<12x384xbf16>, vector<8x384xf32> -> vector<8x384xf32>
    %12 = arith.addf %7, %11 : vector<8x384xf32>
    %c0_12 = arith.constant 0 : index
    %c24 = arith.constant 24 : index
    %13 = vector.load %arg10[%c0_12, %c24] : memref<12x456xbf16, #tpu.memory_space<vmem>>, vector<12x384xbf16>
    %c1 = arith.constant 1 : index
    %c0_13 = arith.constant 0 : index
    %c0_14 = arith.constant 0 : index
    %14 = vector.load %arg2[%c1, %c0_13, %c0_14] : memref<3x8x12xbf16, #tpu.memory_space<vmem>>, vector<1x8x12xbf16>
    %15 = vector.shape_cast %14 : vector<1x8x12xbf16> to vector<8x12xbf16>
    %cst_15 = arith.constant dense<0.000000e+00> : vector<8x384xf32>
    %16 = tpu.matmul %15, %13, %cst_15 {dimension_numbers = #tpu.dot_dimension_numbers<[1], [0], [0], [1], [0, 0, 1, 1], [], []>} : vector<8x12xbf16>, vector<12x384xbf16>, vector<8x384xf32> -> vector<8x384xf32>
    %17 = arith.addf %12, %16 : vector<8x384xf32>
    %c0_16 = arith.constant 0 : index
    %c48 = arith.constant 48 : index
    %18 = vector.load %arg10[%c0_16, %c48] : memref<12x456xbf16, #tpu.memory_space<vmem>>, vector<12x384xbf16>
    %c2 = arith.constant 2 : index
    %c0_17 = arith.constant 0 : index
    %c0_18 = arith.constant 0 : index
    %19 = vector.load %arg2[%c2, %c0_17, %c0_18] : memref<3x8x12xbf16, #tpu.memory_space<vmem>>, vector<1x8x12xbf16>
    %20 = vector.shape_cast %19 : vector<1x8x12xbf16> to vector<8x12xbf16>
    %cst_19 = arith.constant dense<0.000000e+00> : vector<8x384xf32>
    %21 = tpu.matmul %20, %18, %cst_19 {dimension_numbers = #tpu.dot_dimension_numbers<[1], [0], [0], [1], [0, 0, 1, 1], [], []>} : vector<8x12xbf16>, vector<12x384xbf16>, vector<8x384xf32> -> vector<8x384xf32>
    %22 = arith.addf %17, %21 : vector<8x384xf32>
    %c0_20 = arith.constant 0 : index
    %c0_21 = arith.constant 0 : index
    %23 = vector.load %arg3[%c0_20, %c0_21] : memref<8x1xf32, #tpu.memory_space<vmem>>, vector<8x1xf32>
    %24 = vector.broadcast %23 : vector<8x1xf32> to vector<8x384xf32>
    %25 = arith.mulf %22, %24 : vector<8x384xf32>
    %c0_22 = arith.constant 0 : index
    %c0_23 = arith.constant 0 : index
    %26 = vector.load %arg4[%c0_22, %c0_23] : memref<8x1xf32, #tpu.memory_space<vmem>>, vector<8x1xf32>
    %27 = vector.broadcast %26 : vector<8x1xf32> to vector<8x384xf32>
    %28 = arith.addf %25, %27 : vector<8x384xf32>
    %cst_24 = arith.constant 0.000000e+00 : f32
    %29 = vector.broadcast %cst_24 : f32 to vector<8x384xf32>
    %30 = arith.maximumf %28, %29 : vector<8x384xf32>
    %c0_25 = arith.constant 0 : index
    %c0_26 = arith.constant 0 : index
    %31 = vector.load %arg8[%c0_25, %c0_26] : memref<1x384xf32, #tpu.memory_space<vmem>>, vector<1x384xf32>
    %32 = vector.broadcast %31 : vector<1x384xf32> to vector<8x384xf32>
    %33 = arith.mulf %30, %32 : vector<8x384xf32>
    %34 = arith.truncf %33 : vector<8x384xf32> to vector<8x384xbf16>
    %cst_27 = arith.constant 0.000000e+00 : bf16
    %35 = vector.broadcast %cst_27 : bf16 to vector<24x456xbf16>
    %c0_28 = arith.constant 0 : index
    %c0_29 = arith.constant 0 : index
    %36 = vector.load %arg11[%c0_28, %c0_29] : memref<24x456xbf16, #tpu.memory_space<vmem>>, vector<24x456xbf16>
    tpu.vector_store %arg11[%c0_28, %c0_29], %35 {strides = array<i32>} : memref<24x456xbf16, #tpu.memory_space<vmem>>, vector<24x456xbf16>,
    %c0_30 = arith.constant 0 : index
    %c48_31 = arith.constant 48 : index
    %37 = vector.load %arg11[%c0_30, %c48_31] : memref<24x456xbf16, #tpu.memory_space<vmem>>, vector<8x384xbf16>
    tpu.vector_store %arg11[%c0_30, %c48_31], %34 {strides = array<i32>} : memref<24x456xbf16, #tpu.memory_space<vmem>>, vector<8x384xbf16>,
    %c8_32 = arith.constant 8 : index
    %c47 = arith.constant 47 : index
    %38 = vector.load %arg11[%c8_32, %c47] : memref<24x456xbf16, #tpu.memory_space<vmem>>, vector<8x384xbf16>
    tpu.vector_store %arg11[%c8_32, %c47], %34 {strides = array<i32>} : memref<24x456xbf16, #tpu.memory_space<vmem>>, vector<8x384xbf16>,
    %c16 = arith.constant 16 : index
    %c46 = arith.constant 46 : index
    %39 = vector.load %arg11[%c16, %c46] : memref<24x456xbf16, #tpu.memory_space<vmem>>, vector<8x384xbf16>
    tpu.vector_store %arg11[%c16, %c46], %34 {strides = array<i32>} : memref<24x456xbf16, #tpu.memory_space<vmem>>, vector<8x384xbf16>,
    %cst_33 = arith.constant 0.000000e+00 : f32
    %40 = vector.broadcast %cst_33 : f32 to vector<8x384xf32>
    %c0_34 = arith.constant 0 : index
    %c23 = arith.constant 23 : index
    %41 = vector.load %arg11[%c0_34, %c23] : memref<24x456xbf16, #tpu.memory_space<vmem>>, vector<24x384xbf16>
    %c0_35 = arith.constant 0 : index
    %c0_36 = arith.constant 0 : index
    %c0_37 = arith.constant 0 : index
    %42 = vector.load %arg5[%c0_35, %c0_36, %c0_37] : memref<3x8x24xbf16, #tpu.memory_space<vmem>>, vector<1x8x24xbf16>
    %43 = vector.shape_cast %42 : vector<1x8x24xbf16> to vector<8x24xbf16>
    %cst_38 = arith.constant dense<0.000000e+00> : vector<8x384xf32>
    %44 = tpu.matmul %43, %41, %cst_38 {dimension_numbers = #tpu.dot_dimension_numbers<[1], [0], [0], [1], [0, 0, 1, 1], [], []>} : vector<8x24xbf16>, vector<24x384xbf16>, vector<8x384xf32> -> vector<8x384xf32>
    %45 = arith.addf %40, %44 : vector<8x384xf32>
    %c0_39 = arith.constant 0 : index
    %c47_40 = arith.constant 47 : index
    %46 = vector.load %arg11[%c0_39, %c47_40] : memref<24x456xbf16, #tpu.memory_space<vmem>>, vector<24x384xbf16>
    %c1_41 = arith.constant 1 : index
    %c0_42 = arith.constant 0 : index
    %c0_43 = arith.constant 0 : index
    %47 = vector.load %arg5[%c1_41, %c0_42, %c0_43] : memref<3x8x24xbf16, #tpu.memory_space<vmem>>, vector<1x8x24xbf16>
    %48 = vector.shape_cast %47 : vector<1x8x24xbf16> to vector<8x24xbf16>
    %cst_44 = arith.constant dense<0.000000e+00> : vector<8x384xf32>
    %49 = tpu.matmul %48, %46, %cst_44 {dimension_numbers = #tpu.dot_dimension_numbers<[1], [0], [0], [1], [0, 0, 1, 1], [], []>} : vector<8x24xbf16>, vector<24x384xbf16>, vector<8x384xf32> -> vector<8x384xf32>
    %50 = arith.addf %45, %49 : vector<8x384xf32>
    %c0_45 = arith.constant 0 : index
    %c71 = arith.constant 71 : index
    %51 = vector.load %arg11[%c0_45, %c71] : memref<24x456xbf16, #tpu.memory_space<vmem>>, vector<24x384xbf16>
    %c2_46 = arith.constant 2 : index
    %c0_47 = arith.constant 0 : index
    %c0_48 = arith.constant 0 : index
    %52 = vector.load %arg5[%c2_46, %c0_47, %c0_48] : memref<3x8x24xbf16, #tpu.memory_space<vmem>>, vector<1x8x24xbf16>
    %53 = vector.shape_cast %52 : vector<1x8x24xbf16> to vector<8x24xbf16>
    %cst_49 = arith.constant dense<0.000000e+00> : vector<8x384xf32>
    %54 = tpu.matmul %53, %51, %cst_49 {dimension_numbers = #tpu.dot_dimension_numbers<[1], [0], [0], [1], [0, 0, 1, 1], [], []>} : vector<8x24xbf16>, vector<24x384xbf16>, vector<8x384xf32> -> vector<8x384xf32>
    %55 = arith.addf %50, %54 : vector<8x384xf32>
    %c0_50 = arith.constant 0 : index
    %c0_51 = arith.constant 0 : index
    %56 = vector.load %arg6[%c0_50, %c0_51] : memref<8x1xf32, #tpu.memory_space<vmem>>, vector<8x1xf32>
    %57 = vector.broadcast %56 : vector<8x1xf32> to vector<8x384xf32>
    %58 = arith.mulf %55, %57 : vector<8x384xf32>
    %c0_52 = arith.constant 0 : index
    %c0_53 = arith.constant 0 : index
    %59 = vector.load %arg7[%c0_52, %c0_53] : memref<8x1xf32, #tpu.memory_space<vmem>>, vector<8x1xf32>
    %60 = vector.broadcast %59 : vector<8x1xf32> to vector<8x384xf32>
    %61 = arith.addf %58, %60 : vector<8x384xf32>
    %cst_54 = arith.constant 0.000000e+00 : f32
    %62 = vector.broadcast %cst_54 : f32 to vector<8x384xf32>
    %63 = arith.maximumf %61, %62 : vector<8x384xf32>
    %c0_55 = arith.constant 0 : index
    %c48_56 = arith.constant 48 : index
    %64 = vector.load %arg11[%c0_55, %c48_56] : memref<24x456xbf16, #tpu.memory_space<vmem>>, vector<8x384xbf16>
    %65 = arith.extf %64 : vector<8x384xbf16> to vector<8x384xf32>
    %66 = arith.addf %63, %65 : vector<8x384xf32>
    %c0_57 = arith.constant 0 : index
    %c0_58 = arith.constant 0 : index
    %c0_59 = arith.constant 0 : index
    %67 = vector.load %arg9[%c0_57, %c0_58, %c0_59] : memref<1x8x384xf32, #tpu.memory_space<vmem>>, vector<1x8x384xf32>
    %68 = vector.shape_cast %67 : vector<1x8x384xf32> to vector<8x384xf32>
    %69 = vector.shape_cast %66 : vector<8x384xf32> to vector<1x8x384xf32>
    tpu.vector_store %arg9[%c0_57, %c0_58, %c0_59], %69 {strides = array<i32>} : memref<1x8x384xf32, #tpu.memory_space<vmem>>, vector<1x8x384xf32>,
    return
  }
  func.func @transform_0(%arg0: i32) -> (i32, i32, i32) {
    %c0_i32 = arith.constant 0 : i32
    %c0_i32_0 = arith.constant 0 : i32
    %c0_i32_1 = arith.constant 0 : i32
    return %arg0, %c0_i32, %c0_i32_0 : i32, i32, i32
  }
  func.func @transform_1(%arg0: i32) -> (i32, i32, i32) {
    %c0_i32 = arith.constant 0 : i32
    %c0_i32_0 = arith.constant 0 : i32
    %c0_i32_1 = arith.constant 0 : i32
    %c0_i32_2 = arith.constant 0 : i32
    return %c0_i32, %c0_i32_0, %c0_i32_1 : i32, i32, i32
  }
  func.func @transform_2(%arg0: i32) -> (i32, i32) {
    %c0_i32 = arith.constant 0 : i32
    %c0_i32_0 = arith.constant 0 : i32
    %c0_i32_1 = arith.constant 0 : i32
    return %c0_i32, %c0_i32_0 : i32, i32
  }
  func.func @transform_3(%arg0: i32) -> (i32, i32) {
    %c0_i32 = arith.constant 0 : i32
    %c0_i32_0 = arith.constant 0 : i32
    %c0_i32_1 = arith.constant 0 : i32
    return %c0_i32, %c0_i32_0 : i32, i32
  }
  func.func @transform_4(%arg0: i32) -> (i32, i32, i32) {
    %c0_i32 = arith.constant 0 : i32
    %c0_i32_0 = arith.constant 0 : i32
    %c0_i32_1 = arith.constant 0 : i32
    %c0_i32_2 = arith.constant 0 : i32
    return %c0_i32, %c0_i32_0, %c0_i32_1 : i32, i32, i32
  }
  func.func @transform_5(%arg0: i32) -> (i32, i32) {
    %c0_i32 = arith.constant 0 : i32
    %c0_i32_0 = arith.constant 0 : i32
    %c0_i32_1 = arith.constant 0 : i32
    return %c0_i32, %c0_i32_0 : i32, i32
  }
  func.func @transform_6(%arg0: i32) -> (i32, i32) {
    %c0_i32 = arith.constant 0 : i32
    %c0_i32_0 = arith.constant 0 : i32
    %c0_i32_1 = arith.constant 0 : i32
    return %c0_i32, %c0_i32_0 : i32, i32
  }
  func.func @transform_7(%arg0: i32) -> (i32, i32) {
    %c0_i32 = arith.constant 0 : i32
    %c0_i32_0 = arith.constant 0 : i32
    %c0_i32_1 = arith.constant 0 : i32
    return %c0_i32, %c0_i32_0 : i32, i32
  }
  func.func @transform_8(%arg0: i32) -> (i32, i32, i32) {
    %c0_i32 = arith.constant 0 : i32
    %c0_i32_0 = arith.constant 0 : i32
    %c0_i32_1 = arith.constant 0 : i32
    return %arg0, %c0_i32, %c0_i32_0 : i32, i32, i32
  }
}

</mosaic_0001>

<bundles_post_ra>
// kernel: tpu_custom_call.1
= control target key start
LH: loop header
LB: loop body
LE: loop exit
PB: predicated region body
PF: predicated region fallthrough
CT: control target
= control target key end

     0   :  { %13 = vsyncpa [#allocation5], 0  ;;  %s1901_s0 = inlined_call_operand.vmem [shape: bf16[2,4,456], index: 0, kind: input, shape index: {}]   ;;  %s1902_s1 = inlined_call_operand.vmem [shape: bf16[3,8,12], index: 1, kind: input, shape index: {}]   ;;  %s1903_s2 = inlined_call_operand.vmem [shape: f32[8,1], index: 2, kind: input, shape index: {}]   ;;  %s1904_s3 = inlined_call_operand.vmem [shape: f32[8,1], index: 3, kind: input, shape index: {}]   ;;  %s1905_s4 = inlined_call_operand.vmem [shape: bf16[3,8,24], index: 4, kind: input, shape index: {}]   ;;  %s1906_s5 = inlined_call_operand.vmem [shape: f32[8,1], index: 5, kind: input, shape index: {}]   ;;  %s1907_s6 = inlined_call_operand.vmem [shape: f32[8,1], index: 6, kind: input, shape index: {}]   ;;  %s1908_s7 = inlined_call_operand.vmem [shape: f32[1,384], index: 7, kind: input, shape index: {}]   ;;  %s1909_s8 = inlined_call_operand.hbm [shape: f32[2,8,384], index: 8, kind: output, shape index: {}]  }
   0x1   :  { %15 = vsyncpa [#allocation5 + $0x1], 0  ;;  %s1662_s27 = smov 0   ;;  %s1664_s28 = smov 0  }
   0x2   :  { %s1666_s29 = smov 0   ;;  %s1668_s30 = smov 0  }
   0x3 LB: > { %s1683_s9 = sadd.s32 4294967295, %s1600_s30   ;;  %s1351_s10 = sadd.s32 4294967294, %s1600_s30   ;;  %s1600_s30 = sphi %s1668_s30, %s1915_s30   ;;  %s1596_s29 = sphi %s1666_s29, %s1914_s29   ;;  %s1592_s28 = sphi %s1664_s28, %s1913_s28   ;;  %s1588_s27 = sphi %s1662_s27, %s1912_s27  }
   0x4   : > { %s1687_s11 = sadd.s32 1, %s1600_s30   ;;  %s201_s12 = sadd.s32 1, %s1596_s29 }
   0x5   : > { %s198_s13 = ssub.s32 %s1600_s30, %s1687_s11  ;;  %p211_p0 = scmp.ne.s32.totalorder %s1596_s29, %s1592_s28 }
   0x6   : > { %p199_p1 = scmp.eq.s32.totalorder %s198_s13, 0  ;;  %p212_p2 = scmp.eq.s32.totalorder %s1683_s9, 1 }
   0x7   : > { %p217_p3 = scmp.ne.s32.totalorder %s1592_s28, %s1588_s27  ;;  %p218_p4 = scmp.eq.s32.totalorder %s1351_s10, 1 }
   0x8   : > { %s1698_s14 = scalar_select %p199_p1, %s1596_s29, %s201_s12  }
   0x9   : > { %p1700_p5 = por %p212_p2, %p211_p0  ;;  %p1704_p6 = por %p218_p4, %p217_p3 }
   0xa   : > { %p1354_p7 = scmp.ge.s32.totalorder %s1600_s30, 1  ;;  %p265_p8 = scmp.lt.s32.totalorder %s1600_s30, 3 }
   0xc   : > { %p266_p9 = pnand %p1354_p7, %p265_p8 }
   0xd   : > { %p299_p10 = scmp.lt.s32.totalorder (!%p266_p9), %s1683_s9, 1  ;;  %s1603_s22 = smov (!%p266_p9), 126  }
   0xe   : > { %269 = sbr.rel (%p266_p9) target bundleno = 1020 (0x3fc), region = 52  ;;  %s1604_s23 = smov (!%p266_p9), 127  }
   0xf   : > { %s1608_s24 = smov (!%p266_p9), 104   ;;  %s1609_s25 = smov (!%p266_p9), 80  }
  0x10   : > { %s1610_s26 = smov (!%p266_p9), 46   ;;  %s1611_s10 = smov (!%p266_p9), 48  }
  0x11   : > { %s1612_s12 = smov (!%p266_p9), 47   ;;  %s1613_s13 = smov (!%p266_p9), 81  }
  0x13   : > { %v311_v0 = vlaneseq  ;;  %v1602_v1 = vmov 1983009808   ;;  %s300_s17 = scalar_select %p299_p10, %s1683_s9, 1  ;;  %vm326_vm0 = vcmask 586756   ;;  %vm325_vm1 = vcmask 1041408   ;;  %v720_v32 = vld [vmem:[%s1904_s3] sm:$0xff] }
  0x14   : > { %v309_v2 = vunpack.c.l.s4 %v1602_v1  ;;  %vm327_vm2 = vmor %vm326_vm0, %vm325_vm1  ;;  %vm368_vm3 = vcmask 570372   ;;  %vm343_vm4 = vcmask 1043456   ;;  %vm362_vm5 = vcmask 1031168   ;;  %v711_v33 = vld [vmem:[%s1903_s2] sm:$0xff]  ;;  %v1370_v57 = vld [vmem:[%s1902_s1 + $0x8] sm:$0xf] }
  0x15   : > { %v1712_v3 = vshrl.u32 %v311_v0, 7  ;;  %s1398_s18 = sshll.u32 %s300_s17, 3  ;;  %vm351_vm6 = vcmask 1043458   ;;  %vm352_vm7 = vcmask 580614   ;;  %vm369_vm8 = vmor %vm368_vm3, %vm325_vm1  ;;  %vm345_vm9 = vcmask 1039360   ;;  %s1614_s17 = smov 105  }
  0x16   : > { %v310_v4 = vunpack.c.0.s8 %v309_v2  ;;  %s303_s21 = scalar_lea.vmem %s1901_s0, %s1398_s18  ;;  %vm353_vm10 = vmor %vm352_vm7, %vm351_vm6  ;;  %v1605_v26 = vmov 0.0   ;;  %v1606_v27 = vmov 0   ;;  %vm1607_vm11 = vmmov 0   ;;  %v1358_v45 = vld [vmem:[%s1902_s1 + $0x4] sm:$0xf]  ;;  %s1615_s18 = smov 57  }
  0x17   : > { %v305_v6 = vld [vmem:[%s303_s21] sm:$0xff]  ;;  %1416 = vmatprep.subr.bf16.mxu1 %v1605_v26  ;;  %454 = vmatprep.mubr.bf16.mxu0 %v1606_v27  ;;  %755 = vst [vmem:[#allocation3] sm:$0xff] %v1606_v27  ;;  %760 = vst [vmem:[#allocation3 + $0x10] sm:$0xff] %v1606_v27  ;;  %vm404_vm12 = vcmask 850944   ;;  %vm412_vm13 = vcmask 1045504   ;;  %vm408_vm14 = vcmask 97280  }
  0x18   : > { %v313_v5 = vsub.s32 %v310_v4, %v1712_v3  ;;  %1357 = vst.sshfl [vmem:[#allocation2] sm:$0xf pattern:$0x76325410] %v305_v6  ;;  %v329_v8 = vcombine.low %v305_v6, %v305_v6  ;;  %v307_v9 = vcombine.high %v305_v6, %v305_v6  ;;  %762 = vst [vmem:[#allocation3 + $0x20] sm:$0xff] %v1606_v27  ;;  %1418 = vmatprep.mubr.msk.bf16.mxu1 %vm1607_vm11, %v1605_v26  ;;  %vm611_vm15 = vcmask 654336  }
  0x19   : > { %1513 = vset.pattern.permute.xlu0 %v1606_v27  ;;  %1514 = vset.pattern.permute.xlu1 %v1606_v27  ;;  %v375_v54 = vld [vmem:[%s1902_s1] sm:$0xf]  ;;  %vm757_vm0 = vcmask 588804   ;;  %vm821_vm3 = vcmask 1043824   ;;  %vm815_vm6 = vcmask 375808  }
  0x1a   : > { %v314_v7 = vrot.slane %v305_v6, %v313_v5  ;;  %v336_v10 = vrot.slane %v329_v8, %v313_v5  ;;  %v321_v11 = vrot.slane %v307_v9, %v313_v5  ;;  %vm758_vm1 = vmor %vm757_vm0, %vm343_vm4  ;;  %vm803_vm0 = vcmask 1043832  }
  0x1b   : > { %763 = vst.msk [vmem:[#allocation3 + $0x28] sm:$0xff] %vm758_vm1, %v1606_v27  ;;  %759 = vst.msk [vmem:[#allocation3 + $0x8] sm:$0xff] %vm758_vm1, %v1606_v27 }
  0x1c   : > { %355 = vrot.lane.b32.xlu1 %v314_v7, %s1603_s22  ;;  %337 = vrot.lane.b32.xlu0 %v336_v10, %s1604_s23  ;;  %328 = vst.msk [vmem:[#allocation2 + $0x8] sm:$0x33] %vm327_vm2, %v321_v11  ;;  %vm785_vm2 = vcmask 1047556  }
  0x1d   : > { %761 = vst.msk [vmem:[#allocation3 + $0x18] sm:$0xff] %vm758_vm1, %v1606_v27  ;;  %vm822_vm7 = vmor %vm785_vm2, %vm821_vm3  ;;  %vm806_vm1 = vcmask 384004   ;;  %vm797_vm3 = vcmask 384000  }
  0x20   : > { %357 = vrot.lane.b32.xlu1 %v321_v11, %s1603_s22  ;;  %339 = vrot.lane.b32.xlu0 %v314_v7, %s1604_s23 }
  0x8e   : > { %v356_v12 = vpop.permute.xlu1 %355  ;;  %v338_v13 = vpop.permute.xlu0 %337 }
  0x8f   : > { %v359_v15 = vrot.slane %v356_v12, 4  ;;  %v341_v18 = vrot.slane %v338_v13, 4 }
  0x92   : > { %v358_v14 = vpop.permute.xlu1 %357  ;;  %v340_v17 = vpop.permute.xlu0 %339 }
  0x93   : > { %v360_v16 = vrot.slane %v358_v14, 4  ;;  %v342_v21 = vrot.slane %v340_v17, 4 }
  0x95   : > { %v361_v19 = vsel %vm343_vm4, %v359_v15, %v360_v16  ;;  %v364_v20 = vsel %vm362_vm5, %v358_v14, %v360_v16  ;;  %v344_v23 = vsel %vm343_vm4, %v341_v18, %v342_v21  ;;  %v347_v24 = vsel %vm345_vm9, %v340_v17, %v342_v21 }
  0x96   : > { %v363_v22 = vsel %vm362_vm5, %v356_v12, %v361_v19  ;;  %370 = vst.msk [vmem:[#allocation2 + $0x18] sm:$0x33] %vm369_vm8, %v364_v20  ;;  %v346_v25 = vsel %vm345_vm9, %v338_v13, %v344_v23  ;;  %v744_v20 = vsub.s32 2, %v1712_v3  ;;  %v732_v23 = vld [vmem:[%s1908_s7] sm:$0x7]  ;;  %vm824_vm5 = vcmask 375812  }
  0x97   : > { %367 = vst [vmem:[#allocation2 + $0x10] sm:$0x33] %v363_v22  ;;  %354 = vst.msk [vmem:[#allocation2 + $0x8] sm:$0xcc] %vm353_vm10, %v347_v24  ;;  %v736_v24 = vsub.s32 0, %v1712_v3  ;;  %vm784_vm9 = vcmask 1043840  }
  0x98   : > { %350 = vst [vmem:[#allocation2] sm:$0xcc] %v346_v25  ;;  %vm825_vm8 = vmor %vm824_vm5, %vm343_vm4  ;;  %vm788_vm10 = vcmask 392196  }
  0x99   : > { %vm804_vm5 = vmor %vm785_vm2, %vm803_vm0 }
  0x9e   : > { %v1528_v30 = vld [vmem:[#allocation2 + $0xc] ss:$16 sps:$4 sm:$0x3f]   ;;  %v1530_v31 = vld [vmem:[#allocation2 + $0x8] ss:$16 sps:$4 sm:$0x3f]  }
  0x9f   : > { %v1525_v28 = vld [vmem:[#allocation2 + $0x4] ss:$16 sps:$4 sm:$0x3f]   ;;  %v1527_v29 = vld [vmem:[#allocation2] ss:$16 sps:$4 sm:$0x3f]  }
  0xa0   : > { %398 = vrot.lane.b32.xlu1 %v1525_v28, %s1608_s24  ;;  %396 = vrot.lane.b32.xlu0 %v1527_v29, %s1608_s24  ;;  %v1531_v43 = vld [vmem:[#allocation2 + $0x8] ss:$16 sps:$4 sm:$0x3f]   ;;  %v512_v47 = vsel %vm412_vm13, %v1527_v29, 0 }
  0xa1   : > { %v518_v48 = vsel %vm412_vm13, %v1531_v43, 0 }
  0xa4   : > { %402 = vrot.lane.b32.xlu1 %v1528_v30, %s1608_s24  ;;  %400 = vrot.lane.b32.xlu0 %v1530_v31, %s1608_s24  ;;  %s1616_s24 = smov [#allocation4]  }
  0xa8   : > { %605 = vrot.lane.b32.xlu1 %v1525_v28, %s1609_s25  ;;  %603 = vrot.lane.b32.xlu0 %v1527_v29, %s1609_s25 }
  0xac   : > { %609 = vrot.lane.b32.xlu1 %v1528_v30, %s1609_s25  ;;  %607 = vrot.lane.b32.xlu0 %v1530_v31, %s1609_s25  ;;  %v740_v30 = vsub.s32 1, %v1712_v3 }
  0xae   : > { %v741_v43 = vrot.slane %v732_v23, %v740_v30 }
  0xb0   : > { %723 = vperm.xlu1 %1514, %v720_v32   ;;  %714 = vperm.xlu0 %1513, %v711_v33  }
 0x112   : > { %v399_v34 = vpop.permute.xlu1 %398  ;;  %v397_v35 = vpop.permute.xlu0 %396 }
 0x113   : > { %v405_v37 = vsel %vm404_vm12, %v397_v35, %v399_v34 }
 0x114   : > { %v414_v41 = vsel %vm412_vm13, %v405_v37, 0 }
 0x116   : > { %v403_v36 = vpop.permute.xlu1 %402  ;;  %v401_v38 = vpop.permute.xlu0 %400 }
 0x117   : > { %v406_v39 = vsel %vm404_vm12, %v399_v34, %v401_v38  ;;  %v407_v40 = vsel %vm404_vm12, %v401_v38, %v403_v36  ;;  %v745_v36 = vrot.slane %v732_v23, %v744_v20  ;;  %vm778_vm12 = vcmask 392192  }
 0x118   : > { %1363 = vmatprep.subr.msk.bf16.mxu0 %vm412_vm13, %v406_v39  ;;  %v420_v42 = vsel %vm412_vm13, %v407_v40, 0  ;;  %v737_v39 = vrot.slane %v732_v23, %v736_v24  ;;  %v1225_v24 = vld [vmem:[%s1906_s5] sm:$0xff] }
 0x119   : > { %437 = vmatpush1.bf16.msra.mxu0 %v414_v41  ;;  %1417 = vmatpush3.bf16.msra.mxu1 %v420_v42 }
 0x11a   : > { %v606_v44 = vpop.permute.xlu1 %605  ;;  %1367 = vmatprep.subr.msk.bf16.mxu0 %vm412_vm13, %v1525_v28  ;;  %v604_v46 = vpop.permute.xlu0 %603  ;;  %1422 = vmatprep.subr.bf16.mxu1 %v1605_v26 }
 0x11b   : > { %v612_v52 = vsel %vm611_vm15, %v604_v46, %v606_v44 }
 0x11c   : > { %1364 = vmatmul.mubr.msk.bf16.vlgmr.msra.gmra.mxu0 %vm408_vm14, %v1358_v45  ;;  %1419 = vmatmul.mubr.msk.bf16.vlgmr.msra.gmra.mxu1 %vm408_vm14, %v1358_v45  ;;  %v619_v55 = vsel %vm412_vm13, %v612_v52, 0 }
 0x11d   : > { %535 = vmatpush1.bf16.msra.mxu0 %v512_v47  ;;  %1423 = vmatpush3.bf16.msra.mxu1 %v518_v48 }
 0x11e   : > { %v610_v49 = vpop.permute.xlu1 %609  ;;  %v608_v50 = vpop.permute.xlu0 %607  ;;  %552 = vmatprep.mubr.bf16.mxu0 %v1606_v27  ;;  %1424 = vmatprep.mubr.msk.bf16.mxu1 %vm1607_vm11, %v1605_v26 }
 0x11f   : > { %v613_v51 = vsel %vm611_vm15, %v606_v44, %v608_v50  ;;  %1428 = vmatprep.subr.bf16.mxu1 %v1605_v26  ;;  %v614_v53 = vsel %vm611_vm15, %v608_v50, %v610_v49 }
 0x120   : > { %1371 = vmatprep.subr.msk.bf16.mxu0 %vm412_vm13, %v613_v51  ;;  %v625_v56 = vsel %vm412_vm13, %v614_v53, 0  ;;  %vm786_vm13 = vmor %vm785_vm2, %vm784_vm9  ;;  %vm878_vm2 = vcmask 662528   ;;  %vm1119_vm9 = vcmask 465920  }
 0x124   : > { %1368 = vmatmul.mubr.msk.bf16.vlgmr.msra.gmra.mxu0 %vm408_vm14, %v375_v54  ;;  %1425 = vmatmul.mubr.msk.bf16.vlgmr.msra.gmra.mxu1 %vm408_vm14, %v375_v54 }
 0x125   : > { %642 = vmatpush1.bf16.msra.mxu0 %v619_v55  ;;  %1429 = vmatpush3.bf16.msra.mxu1 %v625_v56 }
 0x126   : > { %659 = vmatprep.mubr.bf16.mxu0 %v1606_v27  ;;  %1430 = vmatprep.mubr.msk.bf16.mxu1 %vm1607_vm11, %v1605_v26 }
 0x127   : > { %1434 = vmatprep.subr.bf16.mxu1 %v1605_v26 }
 0x12b   : > { %v715_v13 = vpop.permute.xlu0 %714  ;;  %v724_v19 = vpop.permute.xlu1 %723 }
 0x12c   : > { %1372 = vmatmul.mubr.msk.bf16.vlgmr.msra.gmra.mxu0 %vm408_vm14, %v1370_v57  ;;  %1431 = vmatmul.mubr.msk.bf16.vlgmr.msra.gmra.mxu1 %vm408_vm14, %v1370_v57  ;;  %vm789_vm14 = vmor %vm788_vm10, %vm343_vm4 }
 0x12d   : > { %933 = vmatprep.mubr.bf16.mxu0 %v1606_v27  ;;  %1438 = vmatprep.mubr.msk.bf16.mxu1 %vm1607_vm11, %v1605_v26 }
 0x1dc   : > { %v456_v58 = vpop.f32.mrf.mxu0  ;;  %v497_v59 = vpop.f32.mrf.mxu1 }
 0x1de   : > { %v458_v60 = vpop.f32.mrf.mxu0  ;;  %v1420_v61 = vpop.f32.mrf.mxu1 }
 0x1e0   : > { %v460_v62 = vpop.f32.mrf.mxu0  ;;  %v500_v63 = vpop.f32.mrf.mxu1 }
 0x1e2   : > { %v461_v0 = vpop.f32.mrf.mxu0  ;;  %v1421_v1 = vpop.f32.mrf.mxu1 }
 0x1e4   : > { %v554_v2 = vpop.f32.mrf.mxu0  ;;  %v595_v4 = vpop.f32.mrf.mxu1 }
 0x1e5   : > { %v555_v11 = vadd.f32 %v554_v2, %v456_v58  ;;  %v596_v12 = vadd.f32 %v595_v4, %v497_v59 }
 0x1e6   : > { %v556_v5 = vpop.f32.mrf.mxu0  ;;  %v1426_v6 = vpop.f32.mrf.mxu1 }
 0x1e7   : > { %v557_v16 = vadd.f32 %v556_v5, %v458_v60 }
 0x1e8   : > { %v558_v7 = vpop.f32.mrf.mxu0  ;;  %v598_v8 = vpop.f32.mrf.mxu1 }
 0x1ea   : > { %v559_v9 = vpop.f32.mrf.mxu0  ;;  %v1427_v10 = vpop.f32.mrf.mxu1 }
 0x1ec   : > { %v661_v14 = vpop.f32.mrf.mxu0  ;;  %v702_v15 = vpop.f32.mrf.mxu1 }
 0x1ed   : > { %v708_v17 = vadd.f32 %v661_v14, %v555_v11  ;;  %v710_v18 = vadd.f32 %v702_v15, %v596_v12 }
 0x1ee   : > { %v663_v21 = vpop.f32.mrf.mxu0  ;;  %v1432_v22 = vpop.f32.mrf.mxu1 }
 0x1ef   : > { %v709_v25 = vadd.f32 %v663_v21, %v557_v16  ;;  %v717_v28 = vmul.f32 %v715_v13, %v708_v17  ;;  %v719_v29 = vmul.f32 %v715_v13, %v710_v18  ;;  %v1234_v21 = vld [vmem:[%s1907_s6] sm:$0xff] }
 0x1f0   : > { %v665_v31 = vpop.f32.mrf.mxu0  ;;  %v705_v32 = vpop.f32.mrf.mxu1 }
 0x1f1   : > { %v718_v33 = vmul.f32 %v715_v13, %v709_v25  ;;  %v726_v34 = vadd.f32 %v724_v19, %v717_v28  ;;  %v728_v35 = vadd.f32 %v724_v19, %v719_v29 }
 0x1f2   : > { %v666_v37 = vpop.f32.mrf.mxu0  ;;  %v1433_v38 = vpop.f32.mrf.mxu1 }
 0x1f3   : > { %v727_v40 = vadd.f32 %v724_v19, %v718_v33  ;;  %v729_v41 = vmax.f32 %v726_v34, 0.0  ;;  %v731_v42 = vmax.f32 %v728_v35, 0.0 }
 0x1f5   : > { %v730_v44 = vmax.f32 %v727_v40, 0.0  ;;  %v751_v45 = vmul.f32 %v745_v36, %v731_v42  ;;  %v749_v47 = vmul.f32 %v737_v39, %v729_v41 }
 0x1f7   : > { %v1400_v46 = vpack.c.bf16 %v751_v45, %v751_v45  ;;  %v750_v48 = vmul.f32 %v741_v43, %v730_v44 }
 0x1f9   : > { %811 = vrot.lane.b32.xlu0 %v1400_v46, %s1610_s26  ;;  %v1399_v3 = vpack.c.bf16 %v750_v48, %v749_v47 }
 0x1fb   : > { %809 = vrot.lane.b32.xlu1 %v1399_v3, %s1610_s26  ;;  %s1544_s26 = sshll.u32 %s1616_s24, 4  ;;  %s1545_s26 = int_to_ptr.vmem [resolvable:$false] %s1544_s26 }
 0x1fd   : > { %774 = vrot.lane.b32.xlu0 %v1400_v46, %s1611_s10 }
 0x1ff   : > { %772 = vrot.lane.b32.xlu1 %v1399_v3, %s1611_s10  ;;  %s1546_s10 = scalar_lea.vmem %s1545_s26, 768 }
 0x201   : > { %793 = vrot.lane.b32.xlu0 %v1400_v46, %s1612_s12 }
 0x203   : > { %791 = vrot.lane.b32.xlu1 %v1399_v3, %s1612_s12 }
 0x26b   : > { %v812_v49 = vpop.permute.xlu0 %811 }
 0x26c   : > { %v814_v51 = vrot.slane %v812_v49, 4 }
 0x26d   : > { %v810_v50 = vpop.permute.xlu1 %809 }
 0x26e   : > { %v813_v52 = vrot.slane %v810_v50, 4 }
 0x26f   : > { %v775_v53 = vpop.permute.xlu0 %774 }
 0x270   : > { %v816_v54 = vsel %vm815_vm6, %v813_v52, %v810_v50  ;;  %v817_v55 = vsel %vm343_vm4, %v813_v52, %v814_v51  ;;  %v777_v58 = vrot.slane %v775_v53, 4 }
 0x271   : > { %v818_v56 = vsel %vm815_vm6, %v817_v55, %v812_v49  ;;  %823 = vst.msk [vmem:[#allocation3 + $0x20] sm:$0xff] %vm822_vm7, %v816_v54  ;;  %v773_v57 = vpop.permute.xlu1 %772  ;;  %vm807_vm6 = vmor %vm806_vm1, %vm343_vm4  ;;  %vm998_vm7 = vcmask 859136  }
 0x272   : > { %826 = vst.msk [vmem:[#allocation3 + $0x28] sm:$0xff] %vm825_vm8, %v818_v56  ;;  %v776_v59 = vrot.slane %v773_v57, 4  ;;  %vm888_vm8 = vcmask 195584  }
 0x273   : > { %v794_v60 = vpop.permute.xlu0 %793 }
 0x274   : > { %v779_v61 = vsel %vm778_vm12, %v776_v59, %v773_v57  ;;  %v780_v62 = vsel %vm343_vm4, %v776_v59, %v777_v58  ;;  %v796_v1 = vrot.slane %v794_v60, 4 }
 0x275   : > { %v781_v63 = vsel %vm778_vm12, %v780_v62, %v775_v53  ;;  %787 = vst.msk [vmem:[#allocation3] sm:$0xff] %vm786_vm13, %v779_v61  ;;  %v792_v0 = vpop.permute.xlu1 %791  ;;  %v1376_v53 = vld [vmem:[%s1905_s4 + $0x4] sm:$0xf] }
 0x276   : > { %790 = vst.msk [vmem:[#allocation3 + $0x8] sm:$0xff] %vm789_vm14, %v781_v63  ;;  %v795_v2 = vrot.slane %v792_v0, 4 }
 0x278   : > { %v798_v4 = vsel %vm797_vm3, %v795_v2, %v792_v0  ;;  %v799_v5 = vsel %vm343_vm4, %v795_v2, %v796_v1  ;;  %v831_v6 = vld [vmem:[#allocation3 + $0x20] sm:$0xff] }
 0x279   : > { %v800_v7 = vsel %vm797_vm3, %v799_v5, %v794_v60  ;;  %805 = vst.msk [vmem:[#allocation3 + $0x10] sm:$0xff] %vm804_vm5, %v798_v4  ;;  %v1381_v8 = vcombine.low %v831_v6, %v831_v6  ;;  %v1382_v9 = vcombine.high %v831_v6, %v831_v6  ;;  %v832_v10 = vld [vmem:[#allocation3 + $0x28] sm:$0xff]  ;;  %v833_v2 = vld [vmem:[%s1905_s4] sm:$0xf] }
 0x27a   : > { %808 = vst.msk [vmem:[#allocation3 + $0x18] sm:$0xff] %vm807_vm6, %v800_v7  ;;  %v1384_v14 = vcombine.high %v832_v10, %v832_v10  ;;  %v1383_v20 = vcombine.low %v832_v10, %v832_v10 }
 0x27b   : > { %870 = vrot.lane.b32.xlu1 %v1381_v8, %s1613_s13  ;;  %872 = vrot.lane.b32.xlu0 %v1382_v9, %s1613_s13 }
 0x27c   : > { %v827_v11 = vld [vmem:[#allocation3] sm:$0xff] }
 0x27d   : > { %v828_v16 = vld [vmem:[#allocation3 + $0x8] sm:$0xff]  ;;  %v1248_v28 = vunpack.c.l.bf16 %v827_v11  ;;  %v1249_v29 = vunpack.c.h.bf16 %v827_v11 }
 0x27e   : > { %v1250_v22 = vunpack.c.l.bf16 %v828_v16  ;;  %v1251_v23 = vunpack.c.h.bf16 %v828_v16 }
 0x27f   : > { %992 = vrot.lane.b32.xlu0 %v1382_v9, %s1614_s17  ;;  %v1515_v30 = vpack.i.bf16 %v1249_v29, %v1248_v28 }
 0x280   : > { %v829_v12 = vld [vmem:[#allocation3 + $0x10] sm:$0xff]  ;;  %v1520_v25 = vpack.i.bf16 %v1251_v23, %v1250_v22 }
 0x281   : > { %v1378_v13 = vcombine.high %v827_v11, %v829_v12  ;;  %v830_v15 = vld [vmem:[#allocation3 + $0x18] sm:$0xff]  ;;  %v1377_v17 = vcombine.low %v827_v11, %v829_v12 }
 0x282   : > { %v1379_v18 = vcombine.low %v828_v16, %v830_v15  ;;  %v1380_v19 = vcombine.high %v828_v16, %v830_v15  ;;  %v1391_v15 = vld [vmem:[%s1905_s4 + $0x8] sm:$0xf] }
 0x283   : > { %864 = vrot.lane.b32.xlu1 %v1378_v13, %s1613_s13  ;;  %876 = vrot.lane.b32.xlu0 %v1384_v14, %s1613_s13 }
 0x287   : > { %862 = vrot.lane.b32.xlu1 %v1377_v17, %s1613_s13  ;;  %866 = vrot.lane.b32.xlu0 %v1379_v18, %s1613_s13 }
 0x28b   : > { %990 = vrot.lane.b32.xlu1 %v1381_v8, %s1614_s17  ;;  %868 = vrot.lane.b32.xlu0 %v1380_v19, %s1613_s13 }
 0x28f   : > { %984 = vrot.lane.b32.xlu1 %v1378_v13, %s1614_s17  ;;  %1113 = vrot.lane.b32.xlu0 %v1382_v9, %s1615_s18 }
 0x293   : > { %874 = vrot.lane.b32.xlu1 %v1383_v20, %s1613_s13  ;;  %996 = vrot.lane.b32.xlu0 %v1384_v14, %s1614_s17  ;;  %s296_s13 = sand.u32 1, %s1592_s28  }
 0x297   : > { %982 = vrot.lane.b32.xlu1 %v1377_v17, %s1614_s17  ;;  %986 = vrot.lane.b32.xlu0 %v1379_v18, %s1614_s17 }
 0x29b   : > { %994 = vrot.lane.b32.xlu1 %v1383_v20, %s1614_s17  ;;  %988 = vrot.lane.b32.xlu0 %v1380_v19, %s1614_s17  ;;  %s1458_s17 = smul.u32 24, %s296_s13 }
 0x29d   : > { %s298_s19 = scalar_lea.vmem [#allocation4], %s1458_s17 }
 0x29e   : > { %s1292_s20 = sshll.u32 %s298_s19, 4  ;;  %s1293_s20 = int_to_ptr.vmem [resolvable:$true] %s1292_s20 }
 0x29f   : > { %1111 = vrot.lane.b32.xlu1 %v1381_v8, %s1615_s18  ;;  %1117 = vrot.lane.b32.xlu0 %v1384_v14, %s1615_s18  ;;  %s1540_s23 = scalar_lea.vmem %s1293_s20, 384  ;;  %p1547_p0 = scmp.lt.s32.totalorder %s1293_s20, %s1545_s26 }
 0x2a0   : > { %p1541_p11 = scmp.ne.s32.totalorder %s1293_s20, %s1540_s23  ;;  %p1548_p1 = scmp.lt.s32.totalorder %s1546_s10, %s1540_s23 }
 0x2a2   : > { %p1542_p12 = pnand %p1541_p11, %p1700_p5  ;;  %p1549_p2 = por %p1548_p1, %p1547_p0 }
 0x2a3   : > { %1115 = vrot.lane.b32.xlu1 %v1383_v20, %s1615_s18  ;;  %1107 = vrot.lane.b32.xlu0 %v1379_v18, %s1615_s18 }
 0x2a4   : > { %p1543_p13 = pneg %p1542_p12 }
 0x2a6   : > { %p1550_p3 = pnand %p1549_p2, %p1543_p13 }
 0x2a7   : > { %1105 = vrot.lane.b32.xlu1 %v1378_v13, %s1615_s18  ;;  %1109 = vrot.lane.b32.xlu0 %v1380_v19, %s1615_s18 }
 0x2ab   : > { %1103 = vrot.lane.b32.xlu1 %v1377_v17, %s1615_s18  ;;  %1237 = vperm.xlu0 %1513, %v1234_v21   ;;  %s1459_s18 = smul.u32 384, %s1683_s9  ;;  %s1278_s9 = scalar_lea.sflag [#allocation5], %s296_s13 }
 0x2af   : > { %1228 = vperm.xlu1 %1514, %v1225_v24   ;;  %1521 = vrot.lane.b32.xlu0 %v1520_v25, %s1609_s25 }
 0x2b3   : > { %1516 = vrot.lane.b32.xlu1 %v1515_v30, %s1609_s25  ;;  %s1290_s25 = scalar_lea.hbm %s1909_s8, %s1459_s18 }
 0x2ed   : > { %v873_v31 = vpop.permute.xlu0 %872  ;;  %v871_v32 = vpop.permute.xlu1 %870 }
 0x2ee   : > { %v882_v42 = vsel %vm878_vm2, %v871_v32, %v873_v31 }
 0x2ef   : > { %v893_v47 = vsel %vm343_vm4, %v882_v42, 0 }
 0x2f1   : > { %v993_v33 = vpop.permute.xlu0 %992 }
 0x2f5   : > { %v865_v34 = vpop.permute.xlu1 %864  ;;  %v877_v35 = vpop.permute.xlu0 %876 }
 0x2f9   : > { %v863_v36 = vpop.permute.xlu1 %862  ;;  %v867_v37 = vpop.permute.xlu0 %866 }
 0x2fa   : > { %v880_v3 = vsel %vm878_vm2, %v865_v34, %v867_v37  ;;  %v879_v51 = vsel %vm878_vm2, %v863_v36, %v865_v34 }
 0x2fd   : > { %v991_v38 = vpop.permute.xlu1 %990  ;;  %v869_v39 = vpop.permute.xlu0 %868 }
 0x2fe   : > { %v881_v52 = vsel %vm878_vm2, %v867_v37, %v869_v39  ;;  %v1002_v54 = vsel %vm998_vm7, %v991_v38, %v993_v33 }
 0x2ff   : > { %v1012_v60 = vsel %vm343_vm4, %v1002_v54, 0 }
 0x301   : > { %v985_v40 = vpop.permute.xlu1 %984  ;;  %v1114_v41 = vpop.permute.xlu0 %1113 }
 0x305   : > { %v875_v43 = vpop.permute.xlu1 %874  ;;  %v997_v44 = vpop.permute.xlu0 %996 }
 0x306   : > { %v883_v45 = vsel %vm878_vm2, %v873_v31, %v875_v43  ;;  %v884_v46 = vsel %vm878_vm2, %v875_v43, %v877_v35 }
 0x307   : > { %v899_v48 = vsel %vm343_vm4, %v884_v46, 0  ;;  %1385 = vmatprep.subr.msk.bf16.mxu0 %vm343_vm4, %v883_v45 }
 0x308   : > { %914 = vmatpush1.bf16.msra.mxu0 %v893_v47  ;;  %1435 = vmatpush3.bf16.msra.mxu1 %v899_v48 }
 0x309   : > { %v983_v49 = vpop.permute.xlu1 %982  ;;  %915 = vmatprep.subr.bf16.mxu0 %v880_v3  ;;  %v987_v50 = vpop.permute.xlu0 %986  ;;  %1436 = vmatprep.subr.bf16.mxu1 %v1605_v26 }
 0x30a   : > { %v1000_v62 = vsel %vm998_vm7, %v985_v40, %v987_v50  ;;  %v999_v1 = vsel %vm998_vm7, %v983_v49, %v985_v40 }
 0x30c   : > { %916 = vmatpush1.bf16.msra.mxu0 %v879_v51  ;;  %1437 = vmatpush3.bf16.msra.mxu1 %v881_v52 }
 0x30d   : > { %v995_v55 = vpop.permute.xlu1 %994  ;;  %v989_v56 = vpop.permute.xlu0 %988  ;;  %1442 = vmatprep.subr.bf16.mxu1 %v1605_v26 }
 0x30e   : > { %v1003_v57 = vsel %vm998_vm7, %v993_v33, %v995_v55  ;;  %v1004_v58 = vsel %vm998_vm7, %v995_v55, %v997_v44  ;;  %v1001_v0 = vsel %vm998_vm7, %v987_v50, %v989_v56 }
 0x30f   : > { %v1018_v59 = vsel %vm343_vm4, %v1004_v58, 0  ;;  %1386 = vmatmul.mubr.msk.bf16.vlgmr.msra.gmra.mxu0 %vm888_vm8, %v1376_v53  ;;  %1439 = vmatmul.mubr.msk.bf16.vlgmr.msra.gmra.mxu1 %vm888_vm8, %v1376_v53 }
 0x310   : > { %1388 = vmatprep.subr.msk.bf16.mxu0 %vm343_vm4, %v1003_v57  ;;  %1443 = vmatpush3.bf16.msra.mxu1 %v1018_v59 }
 0x311   : > { %1033 = vmatpush1.bf16.msra.mxu0 %v1012_v60  ;;  %v1112_v61 = vpop.permute.xlu1 %1111  ;;  %v1118_v63 = vpop.permute.xlu0 %1117  ;;  %1444 = vmatprep.subr.bf16.mxu1 %v1605_v26 }
 0x312   : > { %1034 = vmatprep.subr.bf16.mxu0 %v1000_v62  ;;  %1052 = vmatprep.mubr.bf16.mxu0 %v1606_v27  ;;  %v1123_v4 = vsel %vm1119_vm9, %v1112_v61, %v1114_v41 }
 0x313   : > { %1446 = vmatprep.mubr.msk.bf16.mxu1 %vm1607_vm11, %v1605_v26  ;;  %v1133_v10 = vsel %vm343_vm4, %v1123_v4, 0 }
 0x314   : > { %1445 = vmatpush3.bf16.msra.mxu1 %v1001_v0 }
 0x315   : > { %1035 = vmatpush1.bf16.msra.mxu0 %v999_v1  ;;  %v1116_v5 = vpop.permute.xlu1 %1115  ;;  %v1108_v6 = vpop.permute.xlu0 %1107  ;;  %1450 = vmatprep.subr.bf16.mxu1 %v1605_v26 }
 0x316   : > { %v1124_v7 = vsel %vm1119_vm9, %v1114_v41, %v1116_v5  ;;  %v1125_v8 = vsel %vm1119_vm9, %v1116_v5, %v1118_v63 }
 0x317   : > { %v1139_v9 = vsel %vm343_vm4, %v1125_v8, 0  ;;  %1447 = vmatmul.mubr.msk.bf16.vlgmr.msra.gmra.mxu1 %vm888_vm8, %v833_v2  ;;  %1392 = vmatprep.subr.msk.bf16.mxu0 %vm343_vm4, %v1124_v7 }
 0x318   : > { %1389 = vmatmul.mubr.msk.bf16.vlgmr.msra.gmra.mxu0 %vm888_vm8, %v833_v2  ;;  %1451 = vmatpush3.bf16.msra.mxu1 %v1139_v9 }
 0x319   : > { %1154 = vmatpush1.bf16.msra.mxu0 %v1133_v10  ;;  %v1106_v11 = vpop.permute.xlu1 %1105  ;;  %v1110_v12 = vpop.permute.xlu0 %1109  ;;  %1452 = vmatprep.subr.bf16.mxu1 %v1605_v26 }
 0x31a   : > { %v1122_v13 = vsel %vm1119_vm9, %v1108_v6, %v1110_v12  ;;  %v1121_v14 = vsel %vm1119_vm9, %v1106_v11, %v1108_v6  ;;  %1454 = vmatprep.mubr.msk.bf16.mxu1 %vm1607_vm11, %v1605_v26  ;;  %1173 = vmatprep.mubr.bf16.mxu0 %v1606_v27 }
 0x31b   : > { %1155 = vmatprep.subr.bf16.mxu0 %v1121_v14 }
 0x31c   : > { %1453 = vmatpush3.bf16.msra.mxu1 %v1122_v13 }
 0x31d   : > { %v1104_v16 = vpop.permute.xlu1 %1103 }
 0x31e   : > { %v1120_v17 = vsel %vm1119_vm9, %v1104_v16, %v1106_v11 }
 0x31f   : > { %1156 = vmatpush1.bf16.msra.mxu0 %v1120_v17  ;;  %1455 = vmatmul.mubr.msk.bf16.vlgmr.msra.gmra.mxu1 %vm888_vm8, %v1391_v15 }
 0x322   : > { %1393 = vmatmul.mubr.msk.bf16.vlgmr.msra.gmra.mxu0 %vm888_vm8, %v1391_v15 }
 0x326   : > { %v1238_v29 = vpop.permute.xlu0 %1237 }
 0x32a   : > { %v1229_v33 = vpop.permute.xlu1 %1228  ;;  %v1522_v38 = vpop.permute.xlu0 %1521 }
 0x32b   : > { %v1524_v44 = vunpack.i.h.bf16 %v1522_v38  ;;  %v1523_v45 = vunpack.i.l.bf16 %v1522_v38 }
 0x32d   : > { %v1267_v58 = vsel %vm611_vm15, %v1523_v45, %v1524_v44 }
 0x32e   : > { %v1517_v46 = vpop.permute.xlu1 %1516 }
 0x32f   : > { %v1519_v54 = vunpack.i.h.bf16 %v1517_v46  ;;  %v1518_v55 = vunpack.i.l.bf16 %v1517_v46 }
 0x331   : > { %v1265_v1 = vsel %vm611_vm15, %v1518_v55, %v1519_v54  ;;  %v1266_v5 = vsel %vm611_vm15, %v1519_v54, %v1523_v45 }
 0x3cf   : > { %v935_v18 = vpop.f32.mrf.mxu0  ;;  %v976_v19 = vpop.f32.mrf.mxu1 }
 0x3d1   : > { %v937_v20 = vpop.f32.mrf.mxu0  ;;  %v1440_v26 = vpop.f32.mrf.mxu1 }
 0x3d3   : > { %v939_v21 = vpop.f32.mrf.mxu0  ;;  %v979_v27 = vpop.f32.mrf.mxu1 }
 0x3d5   : > { %v940_v22 = vpop.f32.mrf.mxu0  ;;  %v1441_v23 = vpop.f32.mrf.mxu1 }
 0x3d7   : > { %v1095_v24 = vpop.f32.mrf.mxu1 }
 0x3d8   : > { %v1054_v25 = vpop.f32.mrf.mxu0  ;;  %v1096_v35 = vadd.f32 %v1095_v24, %v976_v19 }
 0x3d9   : > { %v1448_v28 = vpop.f32.mrf.mxu1  ;;  %v1055_v40 = vadd.f32 %v1054_v25, %v935_v18 }
 0x3da   : > { %v1056_v30 = vpop.f32.mrf.mxu0 }
 0x3db   : > { %v1098_v31 = vpop.f32.mrf.mxu1  ;;  %v1057_v47 = vadd.f32 %v1056_v30, %v937_v20 }
 0x3dc   : > { %v1058_v32 = vpop.f32.mrf.mxu0 }
 0x3dd   : > { %v1449_v34 = vpop.f32.mrf.mxu1 }
 0x3de   : > { %v1059_v36 = vpop.f32.mrf.mxu0 }
 0x3df   : > { %v1216_v37 = vpop.f32.mrf.mxu1 }
 0x3e0   : > { %v1224_v39 = vadd.f32 %v1216_v37, %v1096_v35 }
 0x3e1   : > { %v1456_v41 = vpop.f32.mrf.mxu1 }
 0x3e2   : > { %v1233_v42 = vmul.f32 %v1229_v33, %v1224_v39  ;;  %v1175_v43 = vpop.f32.mrf.mxu0 }
 0x3e3   : > { %v1222_v48 = vadd.f32 %v1175_v43, %v1055_v40  ;;  %v1219_v3 = vpop.f32.mrf.mxu1 }
 0x3e4   : > { %v1242_v49 = vadd.f32 %v1238_v29, %v1233_v42  ;;  %v1177_v50 = vpop.f32.mrf.mxu0 }
 0x3e5   : > { %v1231_v51 = vmul.f32 %v1229_v33, %v1222_v48  ;;  %v1223_v52 = vadd.f32 %v1177_v50, %v1057_v47  ;;  %v1457_v53 = vpop.f32.mrf.mxu1 }
 0x3e6   : > { %v1245_v56 = vmax.f32 %v1242_v49, 0.0  ;;  %v1179_v57 = vpop.f32.mrf.mxu0 }
 0x3e7   : > { %v1240_v59 = vadd.f32 %v1238_v29, %v1231_v51  ;;  %v1232_v60 = vmul.f32 %v1229_v33, %v1223_v52 }
 0x3e8   : > { %v1273_v61 = vadd.f32 %v1267_v58, %v1245_v56  ;;  %v1180_v62 = vpop.f32.mrf.mxu0 }
 0x3e9   : > { %v1243_v63 = vmax.f32 %v1240_v59, 0.0  ;;  %v1241_v0 = vadd.f32 %v1238_v29, %v1232_v60 }
 0x3ea   : > { %1276 = vst [vmem:[%s298_s19 + $0x10] sm:$0xff] %v1273_v61 }
 0x3eb   : > { %v1271_v2 = vadd.f32 %v1265_v1, %v1243_v63  ;;  %v1244_v4 = vmax.f32 %v1241_v0, 0.0 }
 0x3ed   : > { %v1272_v6 = vadd.f32 %v1266_v5, %v1244_v4  ;;  %1274 = vst [vmem:[%s298_s19] sm:$0xff] %v1271_v2 }
 0x3ef   : > { %1275 = vst [vmem:[%s298_s19 + $0x8] sm:$0xff] %v1272_v6 }
 0x3f0   : > { %1553 = shalt.err (!%p1550_p3)
}
 0x3f1   : > { %s1554_s12 = scalar_lea.hbm %s1290_s25, 384  ;;  %s1558_s18 = scalar_lea.hbm %s1909_s8, 768 }
 0x3f2   : > { %p1555_p4 = scmp.ne.s32.totalorder %s1290_s25, %s1554_s12  ;;  %p1559_p9 = scmp.lt.s32.totalorder %s1290_s25, %s1909_s8 }
 0x3f3   : > { %p1560_p10 = scmp.lt.s32.totalorder %s1558_s18, %s1554_s12 }
 0x3f4   : > { %p1556_p7 = pnand %p1555_p4, %p1700_p5 }
 0x3f5   : > { %p1561_p11 = por %p1560_p10, %p1559_p9 }
 0x3f6   : > { %p1557_p8 = pneg %p1556_p7 }
 0x3f8   : > { %p1562_p12 = pnand %p1561_p11, %p1557_p8 }
 0x3fa   : > { %1565 = shalt.err (!%p1562_p12)
}
 0x3fb   : > { %1460 = dma.vmem_to_hbm [thread:$0]  (%p1700_p5), %s1293_s20, 384, %s1290_s25, %s1278_s9  }
 0x3fc PF: > { %p1466_p13 = scmp.ge.s32.totalorder %s1600_s30, 2  ;;  %s1304_s22 = sand.u32 1, %s1588_s27  }
 0x3fd   : > { %s1305_s23 = scalar_lea.sflag [#allocation5], %s1304_s22 }
 0x3fe   : > { %p1463_p0 = pnand %p1466_p13, %p1704_p6 }
 0x400   : > { %p1464_p1 = pneg %p1463_p0 }
 0x402   : > { %1583 = dma.done.wait (%p1464_p1), %s1305_s23, 384  }
 0x403   : > { %1585 = vsyncadd (%p1464_p1), %s1305_s23, 4294966912  ;;  %p18_p2 = scmp.ge.s32.totalorder %s1687_s11, 4   ;;  %s1912_s27 = smov %s1592_s28 }
 0x404   : > { %s1913_s28 = smov %s1596_s29  ;;  %s1914_s29 = smov %s1698_s14 }
 0x405   : > { %s1915_s30 = smov %s1687_s11  ;;  %20 = sbr.rel (!%p18_p2) target bundleno = 3 (0x3), region = 91 }
 0x40a   :  { %1310 = vsyncpa [#allocation5], 1 }
 0x40b   :  { %1312 = vsyncpa [#allocation5 + $0x1], 1 }

</bundles_post_ra>
